<compile_context>
chip_gen: v7x
topology: tpu7x:2x2x1
jax: 0.10.0
libtpu: 0.0.40
codegen_flags: <defaults>
</compile_context>

<pallas_src>
import functools

import jax
import jax.numpy as jnp
import numpy as np
from jax import lax
from jax.experimental import pallas as pl
from jax.experimental.pallas import tpu as pltpu

PRECS = 1e-5

_PARASCA = [[1, 6], [50, 1000], [0.05, 0.9], [0.01, 0.5], [0.001, 0.2],
            [0.2, 1], [0, 10], [0, 100], [-2.5, 2.5], [0.5, 10],
            [0, 0.1], [0, 0.2], [0.3, 5], [0, 1]]

# Row indices inside the packed parameter tensor handed to the kernel.
(_P_BETA, _P_FC, _P_K0, _P_K1, _P_K2, _P_LP, _P_PERC, _P_UZL, _P_TT,
 _P_CFMAX, _P_CFR, _P_CWH, _P_BETAET, _P_C) = range(14)
_P_INV_FC, _P_INV_LPFC, _P_CFRXCFMAX = 14, 15, 16
_NPAR = 17


def _pow(a, b):
    # a > 0 at every call site (SM clamped to PRECS, FC/LP > 0); matches torch `**`.
    return jnp.exp(b * jnp.log(a))


def _round_up(v, m):
    return ((v + m - 1) // m) * m


def _hbv_kernel(pm_ref, tm_ref, em_ref, par_ref, w_ref,
                qave_ref, states_ref, state_scr, *, nstep_true):
    """One (Ngrid tile, time chunk) grid step.

    pm/tm/em_ref : [t_chunk, ng]      forcings (broadcast over mu in here)
    par_ref      : [17, mu, ng]       scaled + derived parameters
    w_ref        : [mu, 1]            mu-combination weights (mean by default)
    qave_ref     : [t_chunk, ng]      mu-reduced discharge output
    states_ref   : [5, mu, ng]        final states (written on last time chunk)
    state_scr    : [5, mu, ng]        VMEM state carry across time chunks
    """
    t_blk = pl.program_id(1)
    n_tblk = pl.num_programs(1)
    t_chunk = pm_ref.shape[0]

    @pl.when(t_blk == 0)
    def _init():
        state_scr[...] = jnp.full(state_scr.shape, 0.001, jnp.float32)

    w = w_ref[...]                               # [mu, 1]

    def body(t, carry):
        SNOWPACK, MELTWATER, SM, SUZ, SLZ = carry
        PRECIP = pm_ref[pl.ds(t, 1), :]          # [1, ng] -> broadcast over mu
        Tt = tm_ref[pl.ds(t, 1), :]
        ETp = em_ref[pl.ds(t, 1), :]

        parTT = par_ref[_P_TT]
        parCFMAX = par_ref[_P_CFMAX]

        # snow routine
        RAIN = jnp.where(Tt >= parTT, PRECIP, 0.0)
        SNOW = jnp.where(Tt < parTT, PRECIP, 0.0)
        SNOWPACK = SNOWPACK + SNOW
        melt = jnp.maximum(parCFMAX * (Tt - parTT), 0.0)
        melt = jnp.minimum(melt, SNOWPACK)
        MELTWATER = MELTWATER + melt
        SNOWPACK = SNOWPACK - melt
        refreezing = jnp.maximum(par_ref[_P_CFRXCFMAX] * (parTT - Tt), 0.0)
        refreezing = jnp.minimum(refreezing, MELTWATER)
        SNOWPACK = SNOWPACK + refreezing
        MELTWATER = MELTWATER - refreezing
        tosoil = jnp.maximum(MELTWATER - par_ref[_P_CWH] * SNOWPACK, 0.0)
        MELTWATER = MELTWATER - tosoil

        # soil moisture routine (no per-step divides: 1/FC, 1/(LP*FC) hoisted)
        invFC = par_ref[_P_INV_FC]
        soil_wetness = jnp.clip(_pow(SM * invFC, par_ref[_P_BETA]), 0.0, 1.0)
        recharge = (RAIN + tosoil) * soil_wetness
        excess = jnp.maximum(SM - par_ref[_P_FC], 0.0)
        SM = SM - excess
        evapfactor = jnp.clip(
            _pow(SM * par_ref[_P_INV_LPFC], par_ref[_P_BETAET]), 0.0, 1.0)
        ETact = jnp.minimum(SM, ETp * evapfactor)
        SM = jnp.maximum(SM - ETact, PRECS)
        SM = SM + RAIN + tosoil - recharge
        capillary = jnp.minimum(
            SLZ, par_ref[_P_C] * SLZ * (1.0 - jnp.minimum(SM * invFC, 1.0)))
        SM = jnp.maximum(SM + capillary, PRECS)
        SLZ = jnp.maximum(SLZ - capillary, PRECS)

        # response routine
        SUZ = SUZ + recharge + excess
        PERC = jnp.minimum(SUZ, par_ref[_P_PERC])
        SUZ = SUZ - PERC
        Q0 = par_ref[_P_K0] * jnp.maximum(SUZ - par_ref[_P_UZL], 0.0)
        SUZ = SUZ - Q0
        Q1 = par_ref[_P_K1] * SUZ
        SUZ = SUZ - Q1
        SLZ = SLZ + PERC
        Q2 = par_ref[_P_K2] * SLZ
        SLZ = SLZ - Q2
        Q = Q0 + Q1 + Q2

        # weighted reduction over mu (sublane axis -> XLU slot, essentially free
        # next to the saturated VALU); one full 128-lane row store per step.
        qave_ref[pl.ds(t, 1), :] = jnp.sum(w * Q, axis=0, keepdims=True)
        return SNOWPACK, MELTWATER, SM, SUZ, SLZ

    carry0 = (state_scr[0], state_scr[1], state_scr[2],
              state_scr[3], state_scr[4])
    # Only the final chunk can be partially filled (time axis padded up to a
    # multiple of t_chunk); use a static trip count whenever possible.
    if nstep_true % t_chunk == 0:
        n_valid = t_chunk
    else:
        n_valid = jnp.minimum(t_chunk, nstep_true - t_blk * t_chunk)
    SNOWPACK, MELTWATER, SM, SUZ, SLZ = lax.fori_loop(0, n_valid, body, carry0)

    state_scr[0] = SNOWPACK
    state_scr[1] = MELTWATER
    state_scr[2] = SM
    state_scr[3] = SUZ
    state_scr[4] = SLZ

    @pl.when(t_blk == n_tblk - 1)
    def _finalize():
        states_ref[0] = SNOWPACK
        states_ref[1] = MELTWATER
        states_ref[2] = SM
        states_ref[3] = SUZ
        states_ref[4] = SLZ


def hbv_forward(x, parameters, mu, muwts=None, outstate=False,
                t_chunk=64, ngrid_tile=128):
    """x: [Nstep, Ngrid, 3] (P, T, ETpot); parameters: [Ngrid, 14, mu] in [0,1]."""
    nstep, ngrid, _ = x.shape
    x = x.astype(jnp.float32)

    # ---- scaled + derived parameters, laid out [param, mu, Ngrid_pad] -------
    ngrid_pad = _round_up(ngrid, ngrid_tile)
    raw = parameters.astype(jnp.float32)
    if ngrid_pad != ngrid:
        # benign mid-range pad (keeps FC/LP strictly positive on padded lanes)
        raw = jnp.pad(raw, ((0, ngrid_pad - ngrid), (0, 0), (0, 0)),
                      constant_values=0.5)
    sca = jnp.asarray(_PARASCA, dtype=jnp.float32)
    lb = sca[:, 0][:, None, None]
    ub = sca[:, 1][:, None, None]
    par = lb + jnp.transpose(raw, (1, 2, 0)) * (ub - lb)      # [14, mu, Ngrid_pad]
    derived = jnp.stack([1.0 / par[_P_FC],
                         1.0 / (par[_P_LP] * par[_P_FC]),
                         par[_P_CFR] * par[_P_CFMAX]], axis=0)
    par = jnp.concatenate([par, derived], axis=0)             # [17, mu, Ngrid_pad]

    # ---- mu-combination weights (mean over mu by default) -------------------
    if muwts is None:
        w = jnp.full((mu, 1), 1.0 / mu, dtype=jnp.float32)
    else:
        w = jnp.asarray(muwts, dtype=jnp.float32).reshape(mu, 1)

    # ---- forcings stay un-broadcast: [Nstep_pad, Ngrid_pad] ------------------
    t_chunk = max(8, min(t_chunk, _round_up(nstep, 8)))
    t_chunk = _round_up(t_chunk, 8)
    nstep_pad = _round_up(nstep, t_chunk)
    P = x[:, :, 0]
    T = x[:, :, 1]
    E = x[:, :, 2]
    if nstep_pad != nstep or ngrid_pad != ngrid:
        pads = ((0, nstep_pad - nstep), (0, ngrid_pad - ngrid))
        P = jnp.pad(P, pads)
        T = jnp.pad(T, pads)
        E = jnp.pad(E, pads)

    n_g = ngrid_pad // ngrid_tile
    n_t = nstep_pad // t_chunk

    forcing_spec = pl.BlockSpec((t_chunk, ngrid_tile), lambda g, t: (t, g))
    par_spec = pl.BlockSpec((_NPAR, mu, ngrid_tile), lambda g, t: (0, 0, g))
    w_spec = pl.BlockSpec((mu, 1), lambda g, t: (0, 0))
    state_spec = pl.BlockSpec((5, mu, ngrid_tile), lambda g, t: (0, 0, g))

    out_shape = (
        jax.ShapeDtypeStruct((nstep_pad, ngrid_pad), jnp.float32),  # Q (mu-reduced)
        jax.ShapeDtypeStruct((5, mu, ngrid_pad), jnp.float32),      # final states
    )

    qave, states = pl.pallas_call(
        functools.partial(_hbv_kernel, nstep_true=nstep),
        out_shape=out_shape,
        grid=(n_g, n_t),
        in_specs=[forcing_spec, forcing_spec, forcing_spec, par_spec, w_spec],
        out_specs=(forcing_spec, state_spec),
        scratch_shapes=[pltpu.VMEM((5, mu, ngrid_tile), jnp.float32)],
        compiler_params=pltpu.CompilerParams(
            dimension_semantics=("parallel", "arbitrary")),
    )(P, T, E, par, w)

    Qs = qave[:nstep, :ngrid, None]                            # [Nstep, Ngrid, 1]
    if outstate:
        st = jnp.transpose(states[:, :, :ngrid], (0, 2, 1))    # [5, Ngrid, mu]
        return Qs, st[0], st[1], st[2], st[3], st[4]
    return Qs


def hbv_reference(x, parameters, mu, muwts=None):
    """Pure-JAX reference mirroring the PyTorch time loop (for verification)."""
    nstep, ngrid, _ = x.shape
    sca = jnp.asarray(_PARASCA, dtype=jnp.float32)
    lb = sca[:, 0][None, :, None]
    ub = sca[:, 1][None, :, None]
    par = lb + parameters.astype(jnp.float32) * (ub - lb)      # [Ngrid, 14, mu]
    (parBETA, parFC, parK0, parK1, parK2, parLP, parPERC, parUZL, parTT,
     parCFMAX, parCFR, parCWH, parBETAET, parC) = [par[:, i, :] for i in range(14)]

    x = x.astype(jnp.float32)
    Pm = jnp.broadcast_to(x[:, :, 0:1], (nstep, ngrid, mu))
    Tm = jnp.broadcast_to(x[:, :, 1:2], (nstep, ngrid, mu))
    Em = jnp.broadcast_to(x[:, :, 2:3], (nstep, ngrid, mu))
    init = jnp.full((ngrid, mu), 0.001, dtype=jnp.float32)

    def step(carry, inp):
        SNOWPACK, MELTWATER, SM, SUZ, SLZ = carry
        PRECIP, Tt, ETp = inp
        RAIN = PRECIP * (Tt >= parTT).astype(jnp.float32)
        SNOW = PRECIP * (Tt < parTT).astype(jnp.float32)
        SNOWPACK = SNOWPACK + SNOW
        melt = jnp.minimum(jnp.maximum(parCFMAX * (Tt - parTT), 0.0), SNOWPACK)
        MELTWATER = MELTWATER + melt
        SNOWPACK = SNOWPACK - melt
        refreezing = jnp.minimum(
            jnp.maximum(parCFR * parCFMAX * (parTT - Tt), 0.0), MELTWATER)
        SNOWPACK = SNOWPACK + refreezing
        MELTWATER = MELTWATER - refreezing
        tosoil = jnp.maximum(MELTWATER - parCWH * SNOWPACK, 0.0)
        MELTWATER = MELTWATER - tosoil
        soil_wetness = jnp.clip(_pow(SM / parFC, parBETA), 0.0, 1.0)
        recharge = (RAIN + tosoil) * soil_wetness
        excess = jnp.maximum(SM - parFC, 0.0)
        SM = SM - excess
        evapfactor = jnp.clip(_pow(SM / (parLP * parFC), parBETAET), 0.0, 1.0)
        ETact = jnp.minimum(SM, ETp * evapfactor)
        SM = jnp.maximum(SM - ETact, PRECS)
        SM = SM + RAIN + tosoil - recharge
        capillary = jnp.minimum(
            SLZ, parC * SLZ * (1.0 - jnp.minimum(SM / parFC, 1.0)))
        SM = jnp.maximum(SM + capillary, PRECS)
        SLZ = jnp.maximum(SLZ - capillary, PRECS)
        SUZ = SUZ + recharge + excess
        PERC = jnp.minimum(SUZ, parPERC)
        SUZ = SUZ - PERC
        Q0 = parK0 * jnp.maximum(SUZ - parUZL, 0.0)
        SUZ = SUZ - Q0
        Q1 = parK1 * SUZ
        SUZ = SUZ - Q1
        SLZ = SLZ + PERC
        Q2 = parK2 * SLZ
        SLZ = SLZ - Q2
        return (SNOWPACK, MELTWATER, SM, SUZ, SLZ), Q0 + Q1 + Q2

    _, Qsimmu = lax.scan(step, (init, init, init, init, init), (Pm, Tm, Em))
    if muwts is None:
        return jnp.mean(Qsimmu, axis=-1, keepdims=True)
    return jnp.sum(Qsimmu * jnp.asarray(muwts, jnp.float32), axis=-1,
                   keepdims=True)


if __name__ == "__main__":
    key = jax.random.PRNGKey(0)
    nstep, ngrid, mu = 32, 16, 16
    k1, k2, k3, k4 = jax.random.split(key, 4)

    P = jax.random.uniform(k1, (nstep, ngrid), dtype=jnp.float32) * 10.0        # precip [mm]
    T = jax.random.uniform(k2, (nstep, ngrid), dtype=jnp.float32) * 20.0 - 5.0  # temp [C]
    ETpot = jax.random.uniform(k3, (nstep, ngrid), dtype=jnp.float32) * 3.0     # PET [mm]
    x = jnp.stack([P, T, ETpot], axis=-1)                                       # [Nstep, Ngrid, 3]
    parameters = jax.random.uniform(k4, (ngrid, 14, mu), dtype=jnp.float32)     # [0,1] params

    Qs = jax.block_until_ready(hbv_forward(x, parameters, mu))
    Qs_ref = jax.block_until_ready(hbv_reference(x, parameters, mu))

    assert Qs.shape == (nstep, ngrid, 1)
    np.testing.assert_allclose(np.asarray(Qs), np.asarray(Qs_ref),
                               rtol=2e-3, atol=1e-5)
    print("KERNEL_OK")
</pallas_src>

<mosaic_0001>
module attributes {stable_mosaic.version = 11 : i64} {
  func.func @_hbv_kernel(%arg0: i32, %arg1: i32, %arg2: memref<32x128xf32, #tpu.memory_space<vmem>>, %arg3: memref<32x128xf32, #tpu.memory_space<vmem>>, %arg4: memref<32x128xf32, #tpu.memory_space<vmem>>, %arg5: memref<17x16x128xf32, #tpu.memory_space<vmem>>, %arg6: memref<16x1xf32, #tpu.memory_space<vmem>>, %arg7: memref<32x128xf32, #tpu.memory_space<vmem>>, %arg8: memref<5x16x128xf32, #tpu.memory_space<vmem>>, %arg9: memref<5x16x128xf32, #tpu.memory_space<vmem>>) attributes {dimension_semantics = [#tpu.dimension_semantics<parallel>, #tpu.dimension_semantics<arbitrary>], iteration_bounds = array<i64: 1, 1>, scalar_prefetch = 0 : i64, scratch_operands = 1 : i64, tpu.core_type = #tpu.core_type<tc>, window_params = [{transform_indices = @transform_0, window_bounds = array<i64: 32, 128>}, {transform_indices = @transform_1, window_bounds = array<i64: 32, 128>}, {transform_indices = @transform_2, window_bounds = array<i64: 32, 128>}, {transform_indices = @transform_3, window_bounds = array<i64: 17, 16, 128>}, {pipeline_mode = #tpu.pipeline_mode<synchronous>, transform_indices = @transform_4, window_bounds = array<i64: 16, 1>}, {transform_indices = @transform_5, window_bounds = array<i64: 32, 128>}, {transform_indices = @transform_6, window_bounds = array<i64: 5, 16, 128>}]} {
    %c0_i32 = arith.constant 0 : i32
    %0 = arith.cmpi eq, %arg1, %c0_i32 : i32
    %1 = arith.extui %0 : i1 to i32
    %c0_i32_0 = arith.constant 0 : i32
    %2 = arith.cmpi ne, %1, %c0_i32_0 : i32
    scf.if %2 {
      %cst = arith.constant 1.000000e-03 : f32
      %34 = vector.broadcast %cst : f32 to vector<5x16x128xf32>
      %c0_32 = arith.constant 0 : index
      %c0_33 = arith.constant 0 : index
      %c0_34 = arith.constant 0 : index
      %35 = vector.load %arg9[%c0_32, %c0_33, %c0_34] : memref<5x16x128xf32, #tpu.memory_space<vmem>>, vector<5x16x128xf32>
      tpu.vector_store %arg9[%c0_32, %c0_33, %c0_34], %34 {strides = array<i32>} : memref<5x16x128xf32, #tpu.memory_space<vmem>>, vector<5x16x128xf32>,
    } else {
    }
    %c0 = arith.constant 0 : index
    %c0_1 = arith.constant 0 : index
    %3 = vector.load %arg6[%c0, %c0_1] : memref<16x1xf32, #tpu.memory_space<vmem>>, vector<16x1xf32>
    %c0_2 = arith.constant 0 : index
    %c0_3 = arith.constant 0 : index
    %c0_4 = arith.constant 0 : index
    %4 = vector.load %arg9[%c0_2, %c0_3, %c0_4] : memref<5x16x128xf32, #tpu.memory_space<vmem>>, vector<1x16x128xf32>
    %5 = vector.shape_cast %4 : vector<1x16x128xf32> to vector<16x128xf32>
    %c1 = arith.constant 1 : index
    %c0_5 = arith.constant 0 : index
    %c0_6 = arith.constant 0 : index
    %6 = vector.load %arg9[%c1, %c0_5, %c0_6] : memref<5x16x128xf32, #tpu.memory_space<vmem>>, vector<1x16x128xf32>
    %7 = vector.shape_cast %6 : vector<1x16x128xf32> to vector<16x128xf32>
    %c2 = arith.constant 2 : index
    %c0_7 = arith.constant 0 : index
    %c0_8 = arith.constant 0 : index
    %8 = vector.load %arg9[%c2, %c0_7, %c0_8] : memref<5x16x128xf32, #tpu.memory_space<vmem>>, vector<1x16x128xf32>
    %9 = vector.shape_cast %8 : vector<1x16x128xf32> to vector<16x128xf32>
    %c3 = arith.constant 3 : index
    %c0_9 = arith.constant 0 : index
    %c0_10 = arith.constant 0 : index
    %10 = vector.load %arg9[%c3, %c0_9, %c0_10] : memref<5x16x128xf32, #tpu.memory_space<vmem>>, vector<1x16x128xf32>
    %11 = vector.shape_cast %10 : vector<1x16x128xf32> to vector<16x128xf32>
    %c4 = arith.constant 4 : index
    %c0_11 = arith.constant 0 : index
    %c0_12 = arith.constant 0 : index
    %12 = vector.load %arg9[%c4, %c0_11, %c0_12] : memref<5x16x128xf32, #tpu.memory_space<vmem>>, vector<1x16x128xf32>
    %13 = vector.shape_cast %12 : vector<1x16x128xf32> to vector<16x128xf32>
    %c0_i32_13 = arith.constant 0 : i32
    %c32_i32 = arith.constant 32 : i32
    %14 = arith.addi %c0_i32_13, %c32_i32 : i32
    %c1_i32 = arith.constant 1 : i32
    %15:5 = scf.for %arg10 = %c0_i32_13 to %14 step %c1_i32 iter_args(%arg11 = %5, %arg12 = %7, %arg13 = %9, %arg14 = %11, %arg15 = %13) -> (vector<16x128xf32>, vector<16x128xf32>, vector<16x128xf32>, vector<16x128xf32>, vector<16x128xf32>)  : i32 {
      %34 = arith.index_cast %arg10 : i32 to index
      %c0_32 = arith.constant 0 : index
      %35 = vector.load %arg2[%34, %c0_32] : memref<32x128xf32, #tpu.memory_space<vmem>>, vector<1x128xf32>
      %36 = arith.index_cast %arg10 : i32 to index
      %c0_33 = arith.constant 0 : index
      %37 = vector.load %arg3[%36, %c0_33] : memref<32x128xf32, #tpu.memory_space<vmem>>, vector<1x128xf32>
      %38 = arith.index_cast %arg10 : i32 to index
      %c0_34 = arith.constant 0 : index
      %39 = vector.load %arg4[%38, %c0_34] : memref<32x128xf32, #tpu.memory_space<vmem>>, vector<1x128xf32>
      %c8 = arith.constant 8 : index
      %c0_35 = arith.constant 0 : index
      %c0_36 = arith.constant 0 : index
      %40 = vector.load %arg5[%c8, %c0_35, %c0_36] : memref<17x16x128xf32, #tpu.memory_space<vmem>>, vector<1x16x128xf32>
      %41 = vector.shape_cast %40 : vector<1x16x128xf32> to vector<16x128xf32>
      %c9 = arith.constant 9 : index
      %c0_37 = arith.constant 0 : index
      %c0_38 = arith.constant 0 : index
      %42 = vector.load %arg5[%c9, %c0_37, %c0_38] : memref<17x16x128xf32, #tpu.memory_space<vmem>>, vector<1x16x128xf32>
      %43 = vector.shape_cast %42 : vector<1x16x128xf32> to vector<16x128xf32>
      %44 = vector.broadcast %37 : vector<1x128xf32> to vector<16x128xf32>
      %45 = arith.cmpf oge, %44, %41 : vector<16x128xf32>
      %cst = arith.constant 0.000000e+00 : f32
      %46 = vector.shape_cast %35 : vector<1x128xf32> to vector<1x128xf32>
      %47 = vector.broadcast %46 : vector<1x128xf32> to vector<16x128xf32>
      %48 = vector.broadcast %cst : f32 to vector<16x128xf32>
      %49 = arith.select %45, %47, %48 : vector<16x128xi1>, vector<16x128xf32>
      %50 = vector.broadcast %37 : vector<1x128xf32> to vector<16x128xf32>
      %51 = arith.cmpf olt, %50, %41 : vector<16x128xf32>
      %cst_39 = arith.constant 0.000000e+00 : f32
      %52 = vector.shape_cast %35 : vector<1x128xf32> to vector<1x128xf32>
      %53 = vector.broadcast %52 : vector<1x128xf32> to vector<16x128xf32>
      %54 = vector.broadcast %cst_39 : f32 to vector<16x128xf32>
      %55 = arith.select %51, %53, %54 : vector<16x128xi1>, vector<16x128xf32>
      %56 = arith.addf %arg11, %55 : vector<16x128xf32>
      %57 = vector.broadcast %37 : vector<1x128xf32> to vector<16x128xf32>
      %58 = arith.subf %57, %41 : vector<16x128xf32>
      %59 = arith.mulf %43, %58 : vector<16x128xf32>
      %cst_40 = arith.constant 0.000000e+00 : f32
      %60 = vector.broadcast %cst_40 : f32 to vector<16x128xf32>
      %61 = arith.maximumf %59, %60 : vector<16x128xf32>
      %62 = arith.minimumf %61, %56 : vector<16x128xf32>
      %63 = arith.addf %arg12, %62 : vector<16x128xf32>
      %64 = arith.subf %56, %62 : vector<16x128xf32>
      %c16 = arith.constant 16 : index
      %c0_41 = arith.constant 0 : index
      %c0_42 = arith.constant 0 : index
      %65 = vector.load %arg5[%c16, %c0_41, %c0_42] : memref<17x16x128xf32, #tpu.memory_space<vmem>>, vector<1x16x128xf32>
      %66 = vector.shape_cast %65 : vector<1x16x128xf32> to vector<16x128xf32>
      %67 = vector.broadcast %37 : vector<1x128xf32> to vector<16x128xf32>
      %68 = arith.subf %41, %67 : vector<16x128xf32>
      %69 = arith.mulf %66, %68 : vector<16x128xf32>
      %cst_43 = arith.constant 0.000000e+00 : f32
      %70 = vector.broadcast %cst_43 : f32 to vector<16x128xf32>
      %71 = arith.maximumf %69, %70 : vector<16x128xf32>
      %72 = arith.minimumf %71, %63 : vector<16x128xf32>
      %73 = arith.addf %64, %72 : vector<16x128xf32>
      %74 = arith.subf %63, %72 : vector<16x128xf32>
      %c11 = arith.constant 11 : index
      %c0_44 = arith.constant 0 : index
      %c0_45 = arith.constant 0 : index
      %75 = vector.load %arg5[%c11, %c0_44, %c0_45] : memref<17x16x128xf32, #tpu.memory_space<vmem>>, vector<1x16x128xf32>
      %76 = vector.shape_cast %75 : vector<1x16x128xf32> to vector<16x128xf32>
      %77 = arith.mulf %76, %73 : vector<16x128xf32>
      %78 = arith.subf %74, %77 : vector<16x128xf32>
      %cst_46 = arith.constant 0.000000e+00 : f32
      %79 = vector.broadcast %cst_46 : f32 to vector<16x128xf32>
      %80 = arith.maximumf %78, %79 : vector<16x128xf32>
      %81 = arith.subf %74, %80 : vector<16x128xf32>
      %c14 = arith.constant 14 : index
      %c0_47 = arith.constant 0 : index
      %c0_48 = arith.constant 0 : index
      %82 = vector.load %arg5[%c14, %c0_47, %c0_48] : memref<17x16x128xf32, #tpu.memory_space<vmem>>, vector<1x16x128xf32>
      %83 = vector.shape_cast %82 : vector<1x16x128xf32> to vector<16x128xf32>
      %84 = arith.mulf %arg13, %83 : vector<16x128xf32>
      %c0_49 = arith.constant 0 : index
      %c0_50 = arith.constant 0 : index
      %c0_51 = arith.constant 0 : index
      %85 = vector.load %arg5[%c0_49, %c0_50, %c0_51] : memref<17x16x128xf32, #tpu.memory_space<vmem>>, vector<1x16x128xf32>
      %86 = vector.shape_cast %85 : vector<1x16x128xf32> to vector<16x128xf32>
      %87 = math.log %84 : vector<16x128xf32>
      %88 = arith.mulf %86, %87 : vector<16x128xf32>
      %89 = math.exp %88 : vector<16x128xf32>
      %cst_52 = arith.constant 0.000000e+00 : f32
      %cst_53 = arith.constant 1.000000e+00 : f32
      %90 = vector.broadcast %cst_52 : f32 to vector<16x128xf32>
      %91 = arith.maximumf %90, %89 : vector<16x128xf32>
      %92 = vector.broadcast %cst_53 : f32 to vector<16x128xf32>
      %93 = arith.minimumf %92, %91 : vector<16x128xf32>
      %94 = arith.addf %49, %80 : vector<16x128xf32>
      %95 = arith.mulf %94, %93 : vector<16x128xf32>
      %c1_54 = arith.constant 1 : index
      %c0_55 = arith.constant 0 : index
      %c0_56 = arith.constant 0 : index
      %96 = vector.load %arg5[%c1_54, %c0_55, %c0_56] : memref<17x16x128xf32, #tpu.memory_space<vmem>>, vector<1x16x128xf32>
      %97 = vector.shape_cast %96 : vector<1x16x128xf32> to vector<16x128xf32>
      %98 = arith.subf %arg13, %97 : vector<16x128xf32>
      %cst_57 = arith.constant 0.000000e+00 : f32
      %99 = vector.broadcast %cst_57 : f32 to vector<16x128xf32>
      %100 = arith.maximumf %98, %99 : vector<16x128xf32>
      %101 = arith.subf %arg13, %100 : vector<16x128xf32>
      %c15 = arith.constant 15 : index
      %c0_58 = arith.constant 0 : index
      %c0_59 = arith.constant 0 : index
      %102 = vector.load %arg5[%c15, %c0_58, %c0_59] : memref<17x16x128xf32, #tpu.memory_space<vmem>>, vector<1x16x128xf32>
      %103 = vector.shape_cast %102 : vector<1x16x128xf32> to vector<16x128xf32>
      %104 = arith.mulf %101, %103 : vector<16x128xf32>
      %c12 = arith.constant 12 : index
      %c0_60 = arith.constant 0 : index
      %c0_61 = arith.constant 0 : index
      %105 = vector.load %arg5[%c12, %c0_60, %c0_61] : memref<17x16x128xf32, #tpu.memory_space<vmem>>, vector<1x16x128xf32>
      %106 = vector.shape_cast %105 : vector<1x16x128xf32> to vector<16x128xf32>
      %107 = math.log %104 : vector<16x128xf32>
      %108 = arith.mulf %106, %107 : vector<16x128xf32>
      %109 = math.exp %108 : vector<16x128xf32>
      %cst_62 = arith.constant 0.000000e+00 : f32
      %cst_63 = arith.constant 1.000000e+00 : f32
      %110 = vector.broadcast %cst_62 : f32 to vector<16x128xf32>
      %111 = arith.maximumf %110, %109 : vector<16x128xf32>
      %112 = vector.broadcast %cst_63 : f32 to vector<16x128xf32>
      %113 = arith.minimumf %112, %111 : vector<16x128xf32>
      %114 = vector.broadcast %39 : vector<1x128xf32> to vector<16x128xf32>
      %115 = arith.mulf %114, %113 : vector<16x128xf32>
      %116 = arith.minimumf %101, %115 : vector<16x128xf32>
      %117 = arith.subf %101, %116 : vector<16x128xf32>
      %cst_64 = arith.constant 9.99999974E-6 : f32
      %118 = vector.broadcast %cst_64 : f32 to vector<16x128xf32>
      %119 = arith.maximumf %117, %118 : vector<16x128xf32>
      %120 = arith.addf %119, %49 : vector<16x128xf32>
      %121 = arith.addf %120, %80 : vector<16x128xf32>
      %122 = arith.subf %121, %95 : vector<16x128xf32>
      %c13 = arith.constant 13 : index
      %c0_65 = arith.constant 0 : index
      %c0_66 = arith.constant 0 : index
      %123 = vector.load %arg5[%c13, %c0_65, %c0_66] : memref<17x16x128xf32, #tpu.memory_space<vmem>>, vector<1x16x128xf32>
      %124 = vector.shape_cast %123 : vector<1x16x128xf32> to vector<16x128xf32>
      %125 = arith.mulf %124, %arg15 : vector<16x128xf32>
      %126 = arith.mulf %122, %83 : vector<16x128xf32>
      %cst_67 = arith.constant 1.000000e+00 : f32
      %127 = vector.broadcast %cst_67 : f32 to vector<16x128xf32>
      %128 = arith.minimumf %126, %127 : vector<16x128xf32>
      %cst_68 = arith.constant 1.000000e+00 : f32
      %129 = vector.broadcast %cst_68 : f32 to vector<16x128xf32>
      %130 = arith.subf %129, %128 : vector<16x128xf32>
      %131 = arith.mulf %125, %130 : vector<16x128xf32>
      %132 = arith.minimumf %arg15, %131 : vector<16x128xf32>
      %133 = arith.addf %122, %132 : vector<16x128xf32>
      %cst_69 = arith.constant 9.99999974E-6 : f32
      %134 = vector.broadcast %cst_69 : f32 to vector<16x128xf32>
      %135 = arith.maximumf %133, %134 : vector<16x128xf32>
      %136 = arith.subf %arg15, %132 : vector<16x128xf32>
      %cst_70 = arith.constant 9.99999974E-6 : f32
      %137 = vector.broadcast %cst_70 : f32 to vector<16x128xf32>
      %138 = arith.maximumf %136, %137 : vector<16x128xf32>
      %139 = arith.addf %arg14, %95 : vector<16x128xf32>
      %140 = arith.addf %139, %100 : vector<16x128xf32>
      %c6 = arith.constant 6 : index
      %c0_71 = arith.constant 0 : index
      %c0_72 = arith.constant 0 : index
      %141 = vector.load %arg5[%c6, %c0_71, %c0_72] : memref<17x16x128xf32, #tpu.memory_space<vmem>>, vector<1x16x128xf32>
      %142 = vector.shape_cast %141 : vector<1x16x128xf32> to vector<16x128xf32>
      %143 = arith.minimumf %140, %142 : vector<16x128xf32>
      %144 = arith.subf %140, %143 : vector<16x128xf32>
      %c2_73 = arith.constant 2 : index
      %c0_74 = arith.constant 0 : index
      %c0_75 = arith.constant 0 : index
      %145 = vector.load %arg5[%c2_73, %c0_74, %c0_75] : memref<17x16x128xf32, #tpu.memory_space<vmem>>, vector<1x16x128xf32>
      %146 = vector.shape_cast %145 : vector<1x16x128xf32> to vector<16x128xf32>
      %c7 = arith.constant 7 : index
      %c0_76 = arith.constant 0 : index
      %c0_77 = arith.constant 0 : index
      %147 = vector.load %arg5[%c7, %c0_76, %c0_77] : memref<17x16x128xf32, #tpu.memory_space<vmem>>, vector<1x16x128xf32>
      %148 = vector.shape_cast %147 : vector<1x16x128xf32> to vector<16x128xf32>
      %149 = arith.subf %144, %148 : vector<16x128xf32>
      %cst_78 = arith.constant 0.000000e+00 : f32
      %150 = vector.broadcast %cst_78 : f32 to vector<16x128xf32>
      %151 = arith.maximumf %149, %150 : vector<16x128xf32>
      %152 = arith.mulf %146, %151 : vector<16x128xf32>
      %153 = arith.subf %144, %152 : vector<16x128xf32>
      %c3_79 = arith.constant 3 : index
      %c0_80 = arith.constant 0 : index
      %c0_81 = arith.constant 0 : index
      %154 = vector.load %arg5[%c3_79, %c0_80, %c0_81] : memref<17x16x128xf32, #tpu.memory_space<vmem>>, vector<1x16x128xf32>
      %155 = vector.shape_cast %154 : vector<1x16x128xf32> to vector<16x128xf32>
      %156 = arith.mulf %155, %153 : vector<16x128xf32>
      %157 = arith.subf %153, %156 : vector<16x128xf32>
      %158 = arith.addf %138, %143 : vector<16x128xf32>
      %c4_82 = arith.constant 4 : index
      %c0_83 = arith.constant 0 : index
      %c0_84 = arith.constant 0 : index
      %159 = vector.load %arg5[%c4_82, %c0_83, %c0_84] : memref<17x16x128xf32, #tpu.memory_space<vmem>>, vector<1x16x128xf32>
      %160 = vector.shape_cast %159 : vector<1x16x128xf32> to vector<16x128xf32>
      %161 = arith.mulf %160, %158 : vector<16x128xf32>
      %162 = arith.subf %158, %161 : vector<16x128xf32>
      %163 = arith.addf %152, %156 : vector<16x128xf32>
      %164 = arith.addf %163, %161 : vector<16x128xf32>
      %165 = vector.broadcast %3 : vector<16x1xf32> to vector<16x128xf32>
      %166 = arith.mulf %165, %164 : vector<16x128xf32>
      %cst_85 = arith.constant dense<0.000000e+00> : vector<128xf32>
      %167 = vector.multi_reduction <add>, %166, %cst_85 [0] : vector<16x128xf32> to vector<128xf32>
      %168 = vector.shape_cast %167 : vector<128xf32> to vector<1x128xf32>
      %169 = arith.index_cast %arg10 : i32 to index
      %c0_86 = arith.constant 0 : index
      %170 = vector.load %arg7[%169, %c0_86] : memref<32x128xf32, #tpu.memory_space<vmem>>, vector<1x128xf32>
      tpu.vector_store %arg7[%169, %c0_86], %168 {strides = array<i32>} : memref<32x128xf32, #tpu.memory_space<vmem>>, vector<1x128xf32>,
      scf.yield %73, %81, %135, %157, %162 : vector<16x128xf32>, vector<16x128xf32>, vector<16x128xf32>, vector<16x128xf32>, vector<16x128xf32>
    }
    %c32_i32_14 = arith.constant 32 : i32
    %c0_15 = arith.constant 0 : index
    %c0_16 = arith.constant 0 : index
    %c0_17 = arith.constant 0 : index
    %16 = vector.load %arg9[%c0_15, %c0_16, %c0_17] : memref<5x16x128xf32, #tpu.memory_space<vmem>>, vector<1x16x128xf32>
    %17 = vector.shape_cast %16 : vector<1x16x128xf32> to vector<16x128xf32>
    %18 = vector.shape_cast %15#0 : vector<16x128xf32> to vector<1x16x128xf32>
    tpu.vector_store %arg9[%c0_15, %c0_16, %c0_17], %18 {strides = array<i32>} : memref<5x16x128xf32, #tpu.memory_space<vmem>>, vector<1x16x128xf32>,
    %c1_18 = arith.constant 1 : index
    %c0_19 = arith.constant 0 : index
    %c0_20 = arith.constant 0 : index
    %19 = vector.load %arg9[%c1_18, %c0_19, %c0_20] : memref<5x16x128xf32, #tpu.memory_space<vmem>>, vector<1x16x128xf32>
    %20 = vector.shape_cast %19 : vector<1x16x128xf32> to vector<16x128xf32>
    %21 = vector.shape_cast %15#1 : vector<16x128xf32> to vector<1x16x128xf32>
    tpu.vector_store %arg9[%c1_18, %c0_19, %c0_20], %21 {strides = array<i32>} : memref<5x16x128xf32, #tpu.memory_space<vmem>>, vector<1x16x128xf32>,
    %c2_21 = arith.constant 2 : index
    %c0_22 = arith.constant 0 : index
    %c0_23 = arith.constant 0 : index
    %22 = vector.load %arg9[%c2_21, %c0_22, %c0_23] : memref<5x16x128xf32, #tpu.memory_space<vmem>>, vector<1x16x128xf32>
    %23 = vector.shape_cast %22 : vector<1x16x128xf32> to vector<16x128xf32>
    %24 = vector.shape_cast %15#2 : vector<16x128xf32> to vector<1x16x128xf32>
    tpu.vector_store %arg9[%c2_21, %c0_22, %c0_23], %24 {strides = array<i32>} : memref<5x16x128xf32, #tpu.memory_space<vmem>>, vector<1x16x128xf32>,
    %c3_24 = arith.constant 3 : index
    %c0_25 = arith.constant 0 : index
    %c0_26 = arith.constant 0 : index
    %25 = vector.load %arg9[%c3_24, %c0_25, %c0_26] : memref<5x16x128xf32, #tpu.memory_space<vmem>>, vector<1x16x128xf32>
    %26 = vector.shape_cast %25 : vector<1x16x128xf32> to vector<16x128xf32>
    %27 = vector.shape_cast %15#3 : vector<16x128xf32> to vector<1x16x128xf32>
    tpu.vector_store %arg9[%c3_24, %c0_25, %c0_26], %27 {strides = array<i32>} : memref<5x16x128xf32, #tpu.memory_space<vmem>>, vector<1x16x128xf32>,
    %c4_27 = arith.constant 4 : index
    %c0_28 = arith.constant 0 : index
    %c0_29 = arith.constant 0 : index
    %28 = vector.load %arg9[%c4_27, %c0_28, %c0_29] : memref<5x16x128xf32, #tpu.memory_space<vmem>>, vector<1x16x128xf32>
    %29 = vector.shape_cast %28 : vector<1x16x128xf32> to vector<16x128xf32>
    %30 = vector.shape_cast %15#4 : vector<16x128xf32> to vector<1x16x128xf32>
    tpu.vector_store %arg9[%c4_27, %c0_28, %c0_29], %30 {strides = array<i32>} : memref<5x16x128xf32, #tpu.memory_space<vmem>>, vector<1x16x128xf32>,
    %c0_i32_30 = arith.constant 0 : i32
    %31 = arith.cmpi eq, %arg1, %c0_i32_30 : i32
    %32 = arith.extui %31 : i1 to i32
    %c0_i32_31 = arith.constant 0 : i32
    %33 = arith.cmpi ne, %32, %c0_i32_31 : i32
    scf.if %33 {
      %c0_32 = arith.constant 0 : index
      %c0_33 = arith.constant 0 : index
      %c0_34 = arith.constant 0 : index
      %34 = vector.load %arg8[%c0_32, %c0_33, %c0_34] : memref<5x16x128xf32, #tpu.memory_space<vmem>>, vector<1x16x128xf32>
      %35 = vector.shape_cast %34 : vector<1x16x128xf32> to vector<16x128xf32>
      %36 = vector.shape_cast %15#0 : vector<16x128xf32> to vector<1x16x128xf32>
      tpu.vector_store %arg8[%c0_32, %c0_33, %c0_34], %36 {strides = array<i32>} : memref<5x16x128xf32, #tpu.memory_space<vmem>>, vector<1x16x128xf32>,
      %c1_35 = arith.constant 1 : index
      %c0_36 = arith.constant 0 : index
      %c0_37 = arith.constant 0 : index
      %37 = vector.load %arg8[%c1_35, %c0_36, %c0_37] : memref<5x16x128xf32, #tpu.memory_space<vmem>>, vector<1x16x128xf32>
      %38 = vector.shape_cast %37 : vector<1x16x128xf32> to vector<16x128xf32>
      %39 = vector.shape_cast %15#1 : vector<16x128xf32> to vector<1x16x128xf32>
      tpu.vector_store %arg8[%c1_35, %c0_36, %c0_37], %39 {strides = array<i32>} : memref<5x16x128xf32, #tpu.memory_space<vmem>>, vector<1x16x128xf32>,
      %c2_38 = arith.constant 2 : index
      %c0_39 = arith.constant 0 : index
      %c0_40 = arith.constant 0 : index
      %40 = vector.load %arg8[%c2_38, %c0_39, %c0_40] : memref<5x16x128xf32, #tpu.memory_space<vmem>>, vector<1x16x128xf32>
      %41 = vector.shape_cast %40 : vector<1x16x128xf32> to vector<16x128xf32>
      %42 = vector.shape_cast %15#2 : vector<16x128xf32> to vector<1x16x128xf32>
      tpu.vector_store %arg8[%c2_38, %c0_39, %c0_40], %42 {strides = array<i32>} : memref<5x16x128xf32, #tpu.memory_space<vmem>>, vector<1x16x128xf32>,
      %c3_41 = arith.constant 3 : index
      %c0_42 = arith.constant 0 : index
      %c0_43 = arith.constant 0 : index
      %43 = vector.load %arg8[%c3_41, %c0_42, %c0_43] : memref<5x16x128xf32, #tpu.memory_space<vmem>>, vector<1x16x128xf32>
      %44 = vector.shape_cast %43 : vector<1x16x128xf32> to vector<16x128xf32>
      %45 = vector.shape_cast %15#3 : vector<16x128xf32> to vector<1x16x128xf32>
      tpu.vector_store %arg8[%c3_41, %c0_42, %c0_43], %45 {strides = array<i32>} : memref<5x16x128xf32, #tpu.memory_space<vmem>>, vector<1x16x128xf32>,
      %c4_44 = arith.constant 4 : index
      %c0_45 = arith.constant 0 : index
      %c0_46 = arith.constant 0 : index
      %46 = vector.load %arg8[%c4_44, %c0_45, %c0_46] : memref<5x16x128xf32, #tpu.memory_space<vmem>>, vector<1x16x128xf32>
      %47 = vector.shape_cast %46 : vector<1x16x128xf32> to vector<16x128xf32>
      %48 = vector.shape_cast %15#4 : vector<16x128xf32> to vector<1x16x128xf32>
      tpu.vector_store %arg8[%c4_44, %c0_45, %c0_46], %48 {strides = array<i32>} : memref<5x16x128xf32, #tpu.memory_space<vmem>>, vector<1x16x128xf32>,
    } else {
    }
    return
  }
  func.func @transform_0(%arg0: i32, %arg1: i32) -> (i32, i32) {
    %c0_i32 = arith.constant 0 : i32
    return %arg1, %arg0 : i32, i32
  }
  func.func @transform_1(%arg0: i32, %arg1: i32) -> (i32, i32) {
    %c0_i32 = arith.constant 0 : i32
    return %arg1, %arg0 : i32, i32
  }
  func.func @transform_2(%arg0: i32, %arg1: i32) -> (i32, i32) {
    %c0_i32 = arith.constant 0 : i32
    return %arg1, %arg0 : i32, i32
  }
  func.func @transform_3(%arg0: i32, %arg1: i32) -> (i32, i32, i32) {
    %c0_i32 = arith.constant 0 : i32
    %c0_i32_0 = arith.constant 0 : i32
    %c0_i32_1 = arith.constant 0 : i32
    return %c0_i32, %c0_i32_0, %arg0 : i32, i32, i32
  }
  func.func @transform_4(%arg0: i32, %arg1: i32) -> (i32, i32) {
    %c0_i32 = arith.constant 0 : i32
    %c0_i32_0 = arith.constant 0 : i32
    %c0_i32_1 = arith.constant 0 : i32
    return %c0_i32, %c0_i32_0 : i32, i32
  }
  func.func @transform_5(%arg0: i32, %arg1: i32) -> (i32, i32) {
    %c0_i32 = arith.constant 0 : i32
    return %arg1, %arg0 : i32, i32
  }
  func.func @transform_6(%arg0: i32, %arg1: i32) -> (i32, i32, i32) {
    %c0_i32 = arith.constant 0 : i32
    %c0_i32_0 = arith.constant 0 : i32
    %c0_i32_1 = arith.constant 0 : i32
    return %c0_i32, %c0_i32_0, %arg0 : i32, i32, i32
  }
}

</mosaic_0001>

<bundles_post_ra>
// kernel: tpu_custom_call.1
= control target key start
LH: loop header
LB: loop body
LE: loop exit
PB: predicated region body
PF: predicated region fallthrough
CT: control target
= control target key end

     0   :  { %12 = vsyncpa [#allocation4], 0  ;;  %s1144_s0 = inlined_call_operand.hbm [shape: f32[32,128], index: 0, kind: input, shape index: {}]   ;;  %s1145_s1 = inlined_call_operand.hbm [shape: f32[32,128], index: 1, kind: input, shape index: {}]   ;;  %s1146_s2 = inlined_call_operand.hbm [shape: f32[32,128], index: 2, kind: input, shape index: {}]   ;;  %s1147_s3 = inlined_call_operand.hbm [shape: f32[17,16,128], index: 3, kind: input, shape index: {}]   ;;  %s1148_s4 = inlined_call_operand.vmem [shape: f32[16,1], index: 4, kind: input, shape index: {}]   ;;  %s1149_s5 = inlined_call_operand.hbm [shape: f32[32,128], index: 5, kind: output, shape index: {0}]   ;;  %s1150_s6 = inlined_call_operand.hbm [shape: f32[5,16,128], index: 6, kind: output, shape index: {1}]  }
   0x1   :  { %13 = vsyncpa [#allocation7], 0 }
   0x2   :  { %14 = vsyncpa [#allocation10], 0 }
   0x3   :  { %15 = vsyncpa [#allocation5], 0 }
   0x4   :  { %16 = vsyncpa [#allocation13], 0  ;;  %s805_s21 = smov [#allocation6]   ;;  %s806_s23 = smov [#allocation3]  }
   0x5   :  { %s34_s22 = sshll.u32 %s805_s21, 4  ;;  %s22_s24 = sshll.u32 %s806_s23, 4  ;;  %s35_s22 = int_to_ptr.vmem [resolvable:$true] %s34_s22  ;;  %s849_s24 = int_to_ptr.vmem [resolvable:$true] %s22_s24 }
   0x6   :  { %s575_s27 = scalar_lea.hbm %s1145_s1, 512 }
   0x7   :  { %p576_p0 = scmp.ne.s32.totalorder %s1145_s1, %s575_s27  ;;  %p579_p1 = scmp.lt.u32.totalorder %s575_s27, %s1145_s1 }
   0x9   :  { %p581_p2 = pnand %p579_p1, %p576_p0 }
   0xb   :  { %584 = shalt.err (!%p581_p2)
}
   0xc   :  { %s585_s8 = scalar_lea.vmem %s35_s22, 512  ;;  %p590_p4 = scmp.lt.s32.totalorder %s35_s22, %s35_s22 }
   0xd   :  { %p586_p3 = scmp.ne.s32.totalorder %s35_s22, %s585_s8  ;;  %p591_p5 = scmp.lt.s32.totalorder %s585_s8, %s585_s8 }
   0xf   :  { %p592_p6 = por %p591_p5, %p590_p4 }
  0x11   :  { %p593_p7 = pnand %p592_p6, %p586_p3 }
  0x13   :  { %596 = shalt.err (!%p593_p7)
}
  0x14   :  { %s807_s9 = smov 128   ;;  %s808_s10 = smov 8  }
  0x15   :  { %40 = dma.hbm_to_vmem [thread:$0]  %s1145_s1, 512, %s35_s22, [#allocation7], %s807_s9, %s807_s9, %s808_s10  }
  0x16   :  { %s597_s15 = scalar_lea.hbm %s1144_s0, 512 }
  0x17   :  { %p598_p8 = scmp.ne.s32.totalorder %s1144_s0, %s597_s15  ;;  %p601_p9 = scmp.lt.u32.totalorder %s597_s15, %s1144_s0 }
  0x19   :  { %p603_p10 = pnand %p601_p9, %p598_p8 }
  0x1b   :  { %606 = shalt.err (!%p603_p10)
}
  0x1c   :  { %s607_s20 = scalar_lea.vmem %s849_s24, 512  ;;  %p612_p12 = scmp.lt.s32.totalorder %s849_s24, %s849_s24 }
  0x1d   :  { %p608_p11 = scmp.ne.s32.totalorder %s849_s24, %s607_s20  ;;  %p613_p13 = scmp.lt.s32.totalorder %s607_s20, %s607_s20 }
  0x1f   :  { %p614_p0 = por %p613_p13, %p612_p12 }
  0x21   :  { %p615_p1 = pnand %p614_p0, %p608_p11 }
  0x23   :  { %618 = shalt.err (!%p615_p1)
}
  0x24   :  { %28 = dma.hbm_to_vmem [thread:$0]  %s1144_s0, 512, %s849_s24, [#allocation4], %s807_s9, %s807_s9, %s808_s10  }
  0x25   :  { %s809_s22 = smov [#allocation8]   ;;  %s810_s25 = smov [#allocation9]  }
  0x26   :  { %s46_s23 = sshll.u32 %s809_s22, 4  ;;  %s58_s26 = sshll.u32 %s810_s25, 4  ;;  %s47_s23 = int_to_ptr.vmem [resolvable:$true] %s46_s23  ;;  %s886_s26 = int_to_ptr.vmem [resolvable:$true] %s58_s26 }
  0x27   :  { %s619_s29 = scalar_lea.hbm %s1146_s2, 512 }
  0x28   :  { %p620_p2 = scmp.ne.s32.totalorder %s1146_s2, %s619_s29  ;;  %p623_p3 = scmp.lt.u32.totalorder %s619_s29, %s1146_s2 }
  0x2a   :  { %p625_p4 = pnand %p623_p3, %p620_p2 }
  0x2c   :  { %628 = shalt.err (!%p625_p4)
}
  0x2d   :  { %s629_s0 = scalar_lea.vmem %s47_s23, 512  ;;  %p634_p6 = scmp.lt.s32.totalorder %s47_s23, %s47_s23 }
  0x2e   :  { %p630_p5 = scmp.ne.s32.totalorder %s47_s23, %s629_s0  ;;  %p635_p7 = scmp.lt.s32.totalorder %s629_s0, %s629_s0 }
  0x30   :  { %p636_p8 = por %p635_p7, %p634_p6 }
  0x32   :  { %p637_p9 = pnand %p636_p8, %p630_p5 }
  0x34   :  { %640 = shalt.err (!%p637_p9)
}
  0x35   :  { %52 = dma.hbm_to_vmem [thread:$0]  %s1146_s2, 512, %s47_s23, [#allocation7], %s807_s9, %s807_s9, %s808_s10  }
  0x36   :  { %s641_s15 = scalar_lea.hbm %s1147_s3, 4352 }
  0x37   :  { %p642_p10 = scmp.ne.s32.totalorder %s1147_s3, %s641_s15  ;;  %p645_p11 = scmp.lt.u32.totalorder %s641_s15, %s1147_s3 }
  0x39   :  { %p647_p12 = pnand %p645_p11, %p642_p10 }
  0x3b   :  { %650 = shalt.err (!%p647_p12)
}
  0x3c   :  { %s651_s20 = scalar_lea.vmem %s886_s26, 4352  ;;  %p656_p0 = scmp.lt.s32.totalorder %s886_s26, %s886_s26 }
  0x3d   :  { %p652_p13 = scmp.ne.s32.totalorder %s886_s26, %s651_s20  ;;  %p657_p1 = scmp.lt.s32.totalorder %s651_s20, %s651_s20 }
  0x3f   :  { %p658_p2 = por %p657_p1, %p656_p0 }
  0x41   :  { %p659_p3 = pnand %p658_p2, %p652_p13 }
  0x43   :  { %662 = shalt.err (!%p659_p3)
}
  0x44   :  { %64 = dma.hbm_to_vmem [thread:$0]  %s1147_s3, 4352, %s886_s26, [#allocation10], %s807_s9, %s807_s9, %s808_s10  }
  0x45   :  { %751 = dma.done.wait [#allocation4], 512  }
  0x46   :  { %752 = vsyncadd [#allocation4], 4294966784 }
  0x47   :  { %753 = dma.done.wait [#allocation7], 1024  }
  0x48   :  { %754 = vsyncadd [#allocation7], 4294966272 }
  0x49   :  { %755 = dma.done.wait [#allocation10], 4352  }
  0x4a   :  { %756 = vsyncadd [#allocation10], 4294962944  ;;  %v926_v0 = vld [vmem:[%s1148_s4] sm:$0xff]  ;;  %v931_v1 = vld [vmem:[%s1148_s4 + $0x8] sm:$0xff]  ;;  %v933_v2 = vmov 0.001  }
  0x4b   :  { %v935_v3 = vmov 0.001   ;;  %v937_v4 = vmov 0.001   ;;  %v939_v5 = vmov 0.001  }
  0x4c   :  { %v941_v6 = vmov 0.001   ;;  %v943_v7 = vmov 0.001   ;;  %v945_v8 = vmov 0.001  }
  0x4d   :  { %v947_v9 = vmov 0.001   ;;  %v949_v10 = vmov 0.001   ;;  %v951_v11 = vmov 0.001  }
  0x4e   :  { %s953_s3 = smov 0  }
  0x4f LB: > { %v811_v12 = vmov 0   ;;  %v980_v13 = vld [vmem:[#allocation9 + $0x80] sm:$0xff]  ;;  %v135_v15 = vld [vmem:[#allocation9 + $0x90] sm:$0xff]  ;;  %s125_s4 = scalar_lea.vmem [#allocation3], %s803_s3  ;;  %s127_s26 = scalar_lea.vmem [#allocation6], %s803_s3  ;;  %v1005_v31 = vld [vmem:[#allocation9 + $0x88] sm:$0xff]  ;;  %s803_s3 = sphi %s953_s3, %s114_s3   ;;  %v799_v11 = vphi %v951_v11, %v1164_v11   ;;  %v795_v10 = vphi %v949_v10, %v1163_v10   ;;  %v791_v9 = vphi %v947_v9, %v1162_v9   ;;  %v787_v8 = vphi %v945_v8, %v1161_v8   ;;  %v783_v7 = vphi %v943_v7, %v1160_v7   ;;  %v779_v6 = vphi %v941_v6, %v1159_v6   ;;  %v775_v5 = vphi %v939_v5, %v1158_v5   ;;  %v771_v4 = vphi %v937_v4, %v1157_v4   ;;  %v767_v3 = vphi %v935_v3, %v1156_v3   ;;  %v763_v2 = vphi %v933_v2, %v1155_v2  }
  0x50   : > { %558 = vset.pattern.permute.xlu0 %v811_v12  ;;  %v982_v14 = vld [vmem:[#allocation9 + $0xe0] sm:$0xff]  ;;  %v219_v17 = vld [vmem:[#allocation9 + $0x10] sm:$0xff]  ;;  %v1007_v33 = vld [vmem:[#allocation9 + $0xe8] sm:$0xff]  ;;  %s129_s27 = scalar_lea.vmem [#allocation8], %s803_s3  ;;  %s354_s28 = scalar_lea.vmem [#allocation11], %s803_s3 }
  0x51   : > { %337 = vperm.xlu0 %558, %v926_v0   ;;  %v196_v16 = vmul.f32 %v783_v7, %v982_v14  ;;  %v987_v18 = vld [vmem:[%s125_s4] ss:$0 sm:$0xff]  ;;  %v221_v21 = vsub.f32 %v783_v7, %v219_v17  ;;  %v228_v29 = vld [vmem:[#allocation9 + $0xf0] sm:$0xff]  ;;  %v136_v35 = vld [vmem:[#allocation9 + $0x98] sm:$0xff]  ;;  %v197_v43 = vmul.f32 %v779_v6, %v1007_v33  ;;  %s114_s3 = sadd.s32 1, %s803_s3  }
  0x52   : > { %v990_v19 = vld [vmem:[%s127_s26] ss:$0 sm:$0xff]  ;;  %v169_v39 = vld [vmem:[#allocation9 + $0x108] sm:$0xff]  ;;  %v220_v40 = vld [vmem:[#allocation9 + $0x18] sm:$0xff]  ;;  %p111_p4 = scmp.ge.s32.totalorder %s114_s3, 32  }
  0x53   : > { %v168_v20 = vld [vmem:[#allocation9 + $0x100] sm:$0xff]  ;;  %vm149_vm0 = vcmp.lt.f32.partialorder %v990_v19, %v980_v13  ;;  %v155_v22 = vsub.f32 %v990_v19, %v980_v13  ;;  %v170_v23 = vsub.f32 %v980_v13, %v990_v19  ;;  %559 = vlog2.f32 %v196_v16  ;;  %v183_v53 = vld [vmem:[#allocation9 + $0xb0] sm:$0xff]  ;;  %v229_v61 = vld [vmem:[#allocation9 + $0xf8] sm:$0xff]  ;;  %s812_s29 = smov (%p111_p4), [#allocation11]   ;;  %s813_s7 = smov (%p111_p4), [#allocation12]  }
  0x54   : > { %v151_v24 = vsel %vm149_vm0, %v987_v18, 0.0  ;;  %v999_v25 = vmax.f32 %v221_v21, 0.0  ;;  %vm150_vm1 = vcmp.lt.f32.partialorder %v990_v19, %v1005_v31  ;;  %v156_v38 = vsub.f32 %v990_v19, %v1005_v31  ;;  %v198_v54 = vld [vmem:[#allocation9] sm:$0xff]  ;;  %v184_v21 = vld [vmem:[#allocation9 + $0xb8] sm:$0xff]  ;;  %s388_s30 = sshll.u32 (%p111_p4), %s812_s29, 4  ;;  %s400_s8 = sshll.u32 (%p111_p4), %s813_s7, 4  ;;  %s389_s30 = int_to_ptr.vmem [resolvable:$true] %s388_s30  ;;  %s1107_s8 = int_to_ptr.vmem [resolvable:$true] %s400_s8 }
  0x55   : > { %342 = vperm.xlu0 %558, %v931_v1   ;;  %v153_v26 = vadd.f32 %v799_v11, %v151_v24  ;;  %v157_v27 = vmul.f32 %v155_v22, %v135_v15  ;;  %v172_v28 = vmul.f32 %v170_v23, %v168_v20  ;;  %v152_v41 = vsel %vm150_vm1, %v987_v18, 0.0  ;;  %v233_v20 = vld [vmem:[#allocation9 + $0xc0] sm:$0xff]  ;;  %s663_s11 = scalar_lea.vmem (%p111_p4), %s389_s30, 512  ;;  %p668_p6 = scmp.lt.s32.totalorder (%p111_p4), %s389_s30, %s389_s30 }
  0x56   : > { %v1003_v30 = vsub.f32 %v783_v7, %v999_v25  ;;  %v171_v42 = vsub.f32 %v1005_v31, %v990_v19  ;;  %v154_v46 = vadd.f32 %v795_v10, %v152_v41  ;;  %v158_v47 = vmul.f32 %v156_v38, %v136_v35  ;;  %p664_p5 = scmp.ne.s32.totalorder (%p111_p4), %s389_s30, %s663_s11  ;;  %p669_p7 = scmp.lt.s32.totalorder (%p111_p4), %s663_s11, %s663_s11 }
  0x57   : > { %v159_v32 = vmax.f32 %v157_v27, 0.0  ;;  %v174_v37 = vmax.f32 %v172_v28, 0.0  ;;  %v222_v49 = vsub.f32 %v779_v6, %v220_v40  ;;  %vm141_vm2 = vcmp.ge.f32.partialorder %v990_v19, %v980_v13 }
  0x58   : > { %v230_v34 = vmul.f32 %v228_v29, %v1003_v30  ;;  %v173_v48 = vmul.f32 %v171_v42, %v169_v39  ;;  %v160_v51 = vmax.f32 %v158_v47, 0.0  ;;  %v199_v29 = vld [vmem:[#allocation9 + $0x8] sm:$0xff]  ;;  %v147_v39 = vsel %vm141_vm2, %v987_v18, 0.0  ;;  %p670_p8 = por (%p111_p4), %p669_p7, %p668_p6 }
  0x59   : > { %v161_v36 = vmin.f32 %v159_v32, %v153_v26  ;;  %v1020_v56 = vmax.f32 %v222_v49, 0.0  ;;  %v234_v42 = vld [vmem:[#allocation9 + $0xc8] sm:$0xff]  ;;  %vm142_vm3 = vcmp.ge.f32.partialorder %v990_v19, %v1005_v31 }
  0x5a   : > { %561 = vlog2.f32 %v230_v34  ;;  %v175_v55 = vmax.f32 %v173_v48, 0.0  ;;  %v162_v60 = vmin.f32 %v160_v51, %v154_v46  ;;  %p671_p9 = pnand (%p111_p4), %p670_p8, %p664_p5 }
  0x5b   : > { %v163_v44 = vadd.f32 %v791_v9, %v161_v36  ;;  %v165_v45 = vsub.f32 %v153_v26, %v161_v36  ;;  %563 = vlog2.f32 %v197_v43  ;;  %v1026_v62 = vsub.f32 %v779_v6, %v1020_v56 }
  0x5c   : > { %v164_v9 = vadd.f32 %v787_v8, %v162_v60  ;;  %v166_v10 = vsub.f32 %v154_v46, %v162_v60 }
  0x5d   : > { %v176_v50 = vmin.f32 %v174_v37, %v163_v44  ;;  %v560_v52 = vpop.eup %559  ;;  %v231_v12 = vmul.f32 %v229_v61, %v1026_v62 }
  0x5e   : > { %v201_v59 = vmul.f32 0.6931472, %v560_v52  ;;  %v177_v17 = vmin.f32 %v175_v55, %v164_v9  ;;  %v295_v55 = vld [vmem:[#allocation9 + $0x60] sm:$0xff] }
  0x5f   : > { %v1022_v11 = vadd.f32 %v176_v50, %v165_v45   ;;  %v180_v58 = vsub.f32 %v163_v44, %v176_v50  ;;  %565 = vlog2.f32 %v231_v12 }
  0x60   : > { %v204_v7 = vmul.f32 %v201_v59, %v198_v54  ;;  %v1033_v10 = vadd.f32 %v177_v17, %v166_v10   ;;  %v181_v26 = vsub.f32 %v164_v9, %v177_v17  ;;  %v459_v54 = vld [vmem:[%s129_s27] ss:$0 sm:$0xff] }
  0x61   : > { %v1151_v57 = vmov %v1022_v11  ;;  %v302_v17 = vld [vmem:[#allocation9 + $0x20] sm:$0xff] }
  0x62   : > { %v185_v63 = vmul.f32 %v183_v53, %v1151_v57  ;;  %v206_v16 = vmul.f32 1.442695, %v204_v7  ;;  %v1152_v23 = vmov %v1033_v10  ;;  %v148_v53 = vsel %vm142_vm3, %v987_v18, 0.0  ;;  %v305_v7 = vld [vmem:[#allocation9 + $0x70] sm:$0xff]  ;;  %369 = vst [vmem:[#allocation12] sm:$0xff] (%p111_p4), %v1151_v57 }
  0x63   : > { %v186_v28 = vmul.f32 %v184_v21, %v1152_v23  ;;  %370 = vst [vmem:[#allocation12 + $0x8] sm:$0xff] (%p111_p4), %v1152_v23 }
  0x64   : > { %v187_v15 = vsub.f32 %v180_v58, %v185_v63  ;;  %v562_v11 = vpop.eup %561  ;;  %567 = vpow2.f32 %v206_v16 }
  0x65   : > { %v236_v6 = vmul.f32 0.6931472, %v562_v11  ;;  %v564_v24 = vpop.eup %563  ;;  %v188_v35 = vsub.f32 %v181_v26, %v186_v28 }
  0x66   : > { %v1031_v22 = vmax.f32 %v187_v15, 0.0  ;;  %v203_v32 = vmul.f32 0.6931472, %v564_v24 }
  0x67   : > { %v239_v8 = vmul.f32 %v236_v6, %v233_v20  ;;  %v1041_v37 = vmax.f32 %v188_v35, 0.0  ;;  %v296_v6 = vld [vmem:[#allocation9 + $0x68] sm:$0xff] }
  0x68   : > { %v1036_v9 = vsub.f32 %v180_v58, %v1031_v22   ;;  %v205_v36 = vmul.f32 %v203_v32, %v199_v29  ;;  %v214_v46 = vadd.f32 %v1031_v22, %v147_v39  ;;  %v316_v29 = vld [vmem:[#allocation9 + $0x30] sm:$0xff] }
  0x69   : > { %v241_v34 = vmul.f32 1.442695, %v239_v8  ;;  %v1045_v8 = vsub.f32 %v181_v26, %v1041_v37   ;;  %v566_v41 = vpop.eup %565  ;;  %v215_v63 = vadd.f32 %v1041_v37, %v148_v53 }
  0x6a   : > { %v1153_v27 = vmov %v1036_v9  ;;  %v208_v38 = vmul.f32 1.442695, %v205_v36  ;;  %v238_v44 = vmul.f32 0.6931472, %v566_v41  ;;  %v306_v36 = vld [vmem:[#allocation9 + $0x78] sm:$0xff] }
  0x6b   : > { %569 = vpow2.f32 %v241_v34  ;;  %v1154_v40 = vmov %v1045_v8  ;;  %372 = vst [vmem:[#allocation12 + $0x10] sm:$0xff] (%p111_p4), %v1153_v27 }
  0x6c   : > { %571 = vpow2.f32 %v208_v38  ;;  %v240_v13 = vmul.f32 %v238_v44, %v234_v42  ;;  %373 = vst [vmem:[#allocation12 + $0x18] sm:$0xff] (%p111_p4), %v1154_v40 }
  0x6e   : > { %v568_v43 = vpop.eup %567  ;;  %v243_v48 = vmul.f32 1.442695, %v240_v13 }
  0x6f   : > { %v210_v45 = vmax.f32 %v568_v43, 0.0  ;;  %v268_v43 = vld [vmem:[#allocation9 + $0xd0] sm:$0xff] }
  0x70   : > { %573 = vpow2.f32 %v243_v48 }
  0x71   : > { %v212_v47 = vmin.f32 %v210_v45, 1.0 }
  0x73   : > { %v216_v49 = vmul.f32 %v214_v46, %v212_v47  ;;  %v303_v46 = vld [vmem:[#allocation9 + $0x28] sm:$0xff] }
  0x75   : > { %v570_v50 = vpop.eup %569  ;;  %v290_v52 = vadd.f32 %v775_v5, %v216_v49 }
  0x76   : > { %v245_v51 = vmax.f32 %v570_v50, 0.0  ;;  %v572_v58 = vpop.eup %571 }
  0x77   : > { %v292_v60 = vadd.f32 %v290_v52, %v999_v25  ;;  %v211_v61 = vmax.f32 %v572_v58, 0.0  ;;  %v317_v52 = vld [vmem:[#allocation9 + $0x38] sm:$0xff] }
  0x78   : > { %v247_v59 = vmin.f32 %v245_v51, 1.0 }
  0x79   : > { %v297_v31 = vmin.f32 %v292_v60, %v295_v55  ;;  %v213_v9 = vmin.f32 %v211_v61, 1.0  ;;  %v269_v61 = vld [vmem:[#allocation9 + $0xd8] sm:$0xff] }
  0x7a   : > { %v253_v19 = vmul.f32 %v459_v54, %v247_v59  ;;  %v574_v16 = vpop.eup %573 }
  0x7b   : > { %v299_v12 = vsub.f32 %v292_v60, %v297_v31  ;;  %v217_v5 = vmul.f32 %v215_v63, %v213_v9  ;;  %v246_v21 = vmax.f32 %v574_v16, 0.0 }
  0x7c   : > { %v255_v10 = vmin.f32 %v1003_v30, %v253_v19 }
  0x7d   : > { %v307_v15 = vsub.f32 %v299_v12, %v305_v7  ;;  %v291_v11 = vadd.f32 %v771_v4, %v217_v5  ;;  %v248_v28 = vmin.f32 %v246_v21, 1.0 }
  0x7e   : > { %v257_v18 = vsub.f32 %v1003_v30, %v255_v10 }
  0x7f   : > { %v309_v25 = vmax.f32 %v307_v15, 0.0  ;;  %v293_v24 = vadd.f32 %v291_v11, %v1020_v56  ;;  %v254_v30 = vmul.f32 %v459_v54, %v248_v28 }
  0x80   : > { %v259_v20 = vmax.f32 %v257_v18, 1e-05  ;;  %v325_v18 = vld [vmem:[#allocation9 + $0x40] sm:$0xff] }
  0x81   : > { %v311_v8 = vmul.f32 %v309_v25, %v302_v17  ;;  %v298_v32 = vmin.f32 %v293_v24, %v296_v6  ;;  %v256_v4 = vmin.f32 %v1026_v62, %v254_v30  ;;  %v326_v6 = vld [vmem:[#allocation9 + $0x48] sm:$0xff] }
  0x82   : > { %v261_v26 = vadd.f32 %v259_v20, %v147_v39 }
  0x83   : > { %v313_v35 = vsub.f32 %v299_v12, %v311_v8  ;;  %v300_v38 = vsub.f32 %v293_v24, %v298_v32  ;;  %v258_v39 = vsub.f32 %v1026_v62, %v256_v4 }
  0x84   : > { %v263_v34 = vadd.f32 %v261_v26, %v1031_v22  ;;  %v270_v22 = vmul.f32 %v767_v3, %v268_v43 }
  0x85   : > { %v318_v42 = vmul.f32 %v316_v29, %v313_v35  ;;  %v308_v44 = vsub.f32 %v300_v38, %v306_v36  ;;  %v260_v48 = vmax.f32 %v258_v39, 1e-05 }
  0x86   : > { %v265_v41 = vsub.f32 %v263_v34, %v216_v49 }
  0x87   : > { %v1062_v56 = vsub.f32 %v313_v35, %v318_v42   ;;  %v310_v13 = vmax.f32 %v308_v44, 0.0  ;;  %v262_v49 = vadd.f32 %v260_v48, %v148_v53  ;;  %v271_v53 = vmul.f32 %v763_v2, %v269_v61 }
  0x88   : > { %v272_v45 = vmul.f32 %v265_v41, %v982_v14  ;;  %v331_v28 = vadd.f32 %v318_v42, %v311_v8  ;;  %v1161_v8 = vmov %v1154_v40 }
  0x89   : > { %v312_v50 = vmul.f32 %v310_v13, %v303_v46  ;;  %v264_v58 = vadd.f32 %v262_v49, %v1041_v37  ;;  %378 = vst [vmem:[#allocation12 + $0x30] sm:$0xff] (%p111_p4), %v1062_v56 }
  0x8a   : > { %v274_v47 = vmin.f32 %v272_v45, 1.0 }
  0x8b   : > { %v314_v54 = vsub.f32 %v300_v38, %v312_v50  ;;  %v266_v60 = vsub.f32 %v264_v58, %v217_v5 }
  0x8c   : > { %v276_v51 = vsub.f32 1.0, %v274_v47 }
  0x8d   : > { %v319_v59 = vmul.f32 %v317_v52, %v314_v54  ;;  %v273_v7 = vmul.f32 %v266_v60, %v1007_v33 }
  0x8e   : > { %v278_v55 = vmul.f32 %v276_v51, %v270_v22 }
  0x8f   : > { %v321_v62 = vsub.f32 %v314_v54, %v319_v59   ;;  %v275_v10 = vmin.f32 %v273_v7, 1.0  ;;  %v332_v29 = vadd.f32 %v319_v59, %v312_v50 }
  0x90   : > { %v280_v14 = vmin.f32 %v767_v3, %v278_v55 }
  0x91   : > { %v277_v16 = vsub.f32 1.0, %v275_v10  ;;  %v1163_v10 = vmov %v1152_v23  ;;  %379 = vst [vmem:[#allocation12 + $0x38] sm:$0xff] (%p111_p4), %v321_v62 }
  0x92   : > { %v282_v63 = vadd.f32 %v280_v14, %v265_v41  ;;  %v286_v19 = vsub.f32 %v767_v3, %v280_v14 }
  0x93   : > { %v279_v17 = vmul.f32 %v277_v16, %v271_v53 }
  0x94   : > { %v284_v12 = vmax.f32 %v282_v63, 1e-05   ;;  %v288_v9 = vmax.f32 %v286_v19, 1e-05 }
  0x95   : > { %v281_v5 = vmin.f32 %v763_v2, %v279_v17 }
  0x96   : > { %v322_v15 = vadd.f32 %v297_v31, %v288_v9  ;;  %v1160_v7 = vmov %v284_v12  ;;  %v1162_v9 = vmov %v1153_v27  ;;  %375 = vst [vmem:[#allocation12 + $0x20] sm:$0xff] (%p111_p4), %v284_v12 }
  0x97   : > { %v283_v11 = vadd.f32 %v281_v5, %v266_v60  ;;  %v287_v25 = vsub.f32 %v763_v2, %v281_v5  ;;  %v1158_v5 = vmov %v1062_v56 }
  0x98   : > { %v327_v37 = vmul.f32 %v325_v18, %v322_v15 }
  0x99   : > { %v285_v21 = vmax.f32 %v283_v11, 1e-05   ;;  %v289_v3 = vmax.f32 %v287_v25, 1e-05  ;;  %v1164_v11 = vmov %v1151_v57 }
  0x9a   : > { %v329_v20 = vsub.f32 %v322_v15, %v327_v37   ;;  %v333_v31 = vadd.f32 %v331_v28, %v327_v37 }
  0x9b   : > { %v323_v33 = vadd.f32 %v298_v32, %v289_v3  ;;  %376 = vst [vmem:[#allocation12 + $0x28] sm:$0xff] (%p111_p4), %v285_v21 }
  0x9c   : > { %v1156_v3 = vmov %v329_v20  ;;  %381 = vst [vmem:[#allocation12 + $0x40] sm:$0xff] (%p111_p4), %v329_v20 }
  0x9d   : > { %v328_v24 = vmul.f32 %v326_v6, %v323_v33  ;;  %v1159_v6 = vmov %v285_v21 }
  0x9f   : > { %v330_v26 = vsub.f32 %v323_v33, %v328_v24   ;;  %v334_v35 = vadd.f32 %v332_v29, %v328_v24 }
  0xa1   :  { %382 = vst [vmem:[#allocation12 + $0x48] sm:$0xff] (%p111_p4), %v330_v26 }
  0xd0   : > { %v338_v34 = vpop.permute.xlu0 %337 }
  0xd1   : > { %v345_v36 = vmul.f32 %v338_v34, %v333_v31 }
  0xd4   : > { %v343_v30 = vpop.permute.xlu0 %342 }
  0xd5   : > { %v346_v38 = vmul.f32 %v343_v30, %v334_v35 }
  0xd7   : > { %v347_v41 = vadd.f32 %v346_v38, %v345_v36 }
  0xd9   : > { %v348_v4 = vrot.slane %v347_v41, 4 }
  0xdb   : > { %v349_v43 = vadd.f32 %v348_v4, %v347_v41  ;;  %v1157_v4 = vmov %v321_v62 }
  0xdd   : > { %v350_v44 = vrot.slane %v349_v43, 2 }
  0xdf   : > { %v351_v2 = vadd.f32 %v350_v44, %v349_v43  ;;  %113 = sbr.rel (!%p111_p4) target bundleno = 79 (0x4f), region = 105 }
  0xe1   : > { %v352_v45 = vrot.slane %v351_v2, 1 }
  0xe3   : > { %v353_v39 = vadd.f32 %v352_v45, %v351_v2  ;;  %v1155_v2 = vmov %v330_v26 }
  0xe5   : > { %355 = vst [vmem:[%s354_s28] sm:$0x1] %v353_v39 }
  0xe6   :  { %674 = shalt.err (!%p671_p9)
}
  0xe7   :  { %s675_s12 = scalar_lea.hbm %s1149_s5, 512 }
  0xe8   :  { %p676_p10 = scmp.ne.s32.totalorder %s1149_s5, %s675_s12  ;;  %p679_p11 = scmp.lt.u32.totalorder %s675_s12, %s1149_s5 }
  0xea   :  { %p681_p12 = pnand %p679_p11, %p676_p10 }
  0xec   :  { %684 = shalt.err (!%p681_p12)
}
  0xed   :  { %394 = dma.vmem_to_hbm [thread:$0]  %s389_s30, 512, %s1149_s5, [#allocation5], %s807_s9, %s807_s9, %s808_s10  }
  0xee   :  { %s685_s19 = scalar_lea.vmem %s1107_s8, 1280  ;;  %p690_p0 = scmp.lt.s32.totalorder %s1107_s8, %s1107_s8 }
  0xef   :  { %p686_p13 = scmp.ne.s32.totalorder %s1107_s8, %s685_s19  ;;  %p691_p1 = scmp.lt.s32.totalorder %s685_s19, %s685_s19 }
  0xf1   :  { %p692_p2 = por %p691_p1, %p690_p0 }
  0xf3   :  { %p693_p3 = pnand %p692_p2, %p686_p13 }
  0xf5   :  { %696 = shalt.err (!%p693_p3)
}
  0xf6   :  { %s697_s1 = scalar_lea.hbm %s1150_s6, 1280 }
  0xf7   :  { %p698_p4 = scmp.ne.s32.totalorder %s1150_s6, %s697_s1  ;;  %p701_p5 = scmp.lt.u32.totalorder %s697_s1, %s1150_s6 }
  0xf9   :  { %p703_p6 = pnand %p701_p5, %p698_p4 }
  0xfb   :  { %706 = shalt.err (!%p703_p6)
}
  0xfc   :  { %406 = dma.vmem_to_hbm [thread:$0]  %s1107_s8, 1280, %s1150_s6, [#allocation13], %s807_s9, %s807_s9, %s808_s10  }
  0xfd   :  { %757 = dma.done.wait [#allocation5], 512  }
  0xfe   :  { %758 = vsyncadd [#allocation5], 4294966784 }
  0xff   :  { %759 = dma.done.wait [#allocation13], 1280  }
 0x100   :  { %760 = vsyncadd [#allocation13], 4294966016 }
 0x101   :  { %413 = vsyncpa [#allocation4], 1 }
 0x102   :  { %414 = vsyncpa [#allocation7], 1 }
 0x103   :  { %415 = vsyncpa [#allocation10], 1 }
 0x104   :  { %416 = vsyncpa [#allocation5], 1 }
 0x105   :  { %417 = vsyncpa [#allocation13], 1 }

</bundles_post_ra>
